<compile_context>
chip_gen: v6e
topology: v6e:2x2x1
jax: 0.10.0
libtpu: 0.0.40
codegen_flags: <defaults>
</compile_context>

<pallas_src>
import math
import functools

import jax
import jax.numpy as jnp
from jax import lax
from jax.experimental import pallas as pl
from jax.experimental.pallas import tpu as pltpu


def _t5_rel_embed_kernel(wt_ref, o_ref, *, tq, row_len, num_buckets,
                         bidirectional, max_dist):
    """One q-row block.

    wt_ref: [num_heads, num_buckets]  (W^T, tiny, VMEM resident)
    o_ref : [num_heads, tq * row_len] (flat, lane-dense, head-major)
    """
    n_flat = tq * row_len
    q0 = pl.program_id(0) * tq

    # flat index n = q_local * row_len + k  over this block, on the lane dim
    n = lax.broadcasted_iota(jnp.int32, (1, n_flat), 1)
    # Recover (q_local, k) without vector integer division:
    # floor((n + 0.5)/row_len) is exact as long as tq*row_len << 2^21
    # (asserted in the wrapper); margin 0.5/row_len >> f32 rounding error.
    q_local = jnp.floor(
        (n.astype(jnp.float32) + 0.5) / float(row_len)).astype(jnp.int32)
    k_ids = n - q_local * row_len
    rel_pos = k_ids - (q0 + q_local)                       # k - q, [1, N]

    # --- _relative_position_bucket (exact T5 semantics) ---------------------
    if bidirectional:
        nb = num_buckets // 2
        buckets = (rel_pos > 0).astype(jnp.int32) * nb
        rel = jnp.abs(rel_pos)
    else:
        nb = num_buckets
        buckets = jnp.zeros_like(rel_pos)
        rel = -jnp.minimum(rel_pos, 0)

    max_exact = nb // 2
    # Clamp to >=1 before log: the log branch is only *selected* when
    # rel >= max_exact, so this never changes the result (avoids -inf/nan).
    rel_f = jnp.maximum(rel, 1).astype(jnp.float32)
    large = max_exact + (
        jnp.log(rel_f / float(max_exact))
        / math.log(max_dist / max_exact)
        * (nb - max_exact)
    ).astype(jnp.int32)  # trunc toward zero == torch .long() for non-negative
    large = jnp.minimum(large, nb - 1)
    buckets = buckets + jnp.where(rel < max_exact, rel, large)   # [1, N] int32

    # --- lane-dense one-hot [B, N] + MXU contraction -> [H, N] ---------------
    bucket_iota = lax.broadcasted_iota(jnp.int32, (num_buckets, n_flat), 0)
    one_hot = (buckets == bucket_iota).astype(jnp.float32)       # [B, N]
    o_ref[...] = jnp.dot(wt_ref[...], one_hot,
                         preferred_element_type=jnp.float32)      # [H, N]


def t5_relative_embedding(weight, lq, lk, *, bidirectional=True, max_dist=128,
                          target_tile_elems=32768):
    """weight: [num_buckets, num_heads] float32. Returns [1, num_heads, lq, lk]."""
    num_buckets, num_heads = weight.shape
    if bidirectional:
        assert num_buckets >= 4, "bidirectional bucket math needs num_buckets >= 4"
    else:
        assert num_buckets >= 2, "bucket math needs num_buckets >= 2"

    # ---- tile selection -----------------------------------------------------
    if lq * lk <= target_tile_elems:
        # Single tile: block == full array dims (always a legal block shape).
        tq, lk_pad = lq, lk
    else:
        # Pad k to a multiple of 128 so every flat block is 128-lane aligned,
        # then tile q so each step handles ~target_tile_elems flat positions.
        lk_pad = ((lk + 127) // 128) * 128
        tq = max(1, target_tile_elems // lk_pad)
        tq = min(tq, lq)
    lq_pad = ((lq + tq - 1) // tq) * tq
    n_block = tq * lk_pad
    # Exactness guard for the flat-index recovery inside the kernel.
    assert n_block <= (1 << 21), "q-tile too wide; shrink target_tile_elems"
    # TODO(synk): extremely long lk (block > 2^21 flat elems) would need an
    # additional k-grid axis; not needed for realistic sequence lengths.

    grid = (lq_pad // tq,)
    w_t = jnp.asarray(weight, jnp.float32).T              # [H, B], tiny

    kernel = functools.partial(
        _t5_rel_embed_kernel,
        tq=tq, row_len=lk_pad, num_buckets=num_buckets,
        bidirectional=bidirectional, max_dist=max_dist,
    )

    cost = pl.CostEstimate(
        flops=2 * num_heads * num_buckets * lq_pad * lk_pad,
        transcendentals=lq_pad * lk_pad,
        bytes_accessed=4 * (num_heads * lq_pad * lk_pad
                            + num_buckets * num_heads),
    )

    out_flat = pl.pallas_call(
        kernel,
        out_shape=jax.ShapeDtypeStruct((num_heads, lq_pad * lk_pad), jnp.float32),
        grid=grid,
        in_specs=[pl.BlockSpec((num_heads, num_buckets), lambda i: (0, 0))],
        out_specs=pl.BlockSpec((num_heads, n_block), lambda i: (0, i)),
        compiler_params=pltpu.CompilerParams(
            dimension_semantics=("parallel",)),
        cost_estimate=cost,
    )(w_t)

    # Free row-major reshape; slices are no-ops when no padding was needed.
    out = out_flat.reshape(num_heads, lq_pad, lk_pad)[:, :lq, :lk]
    return out[None]                                        # [1, H, lq, lk]


# --- pure-JAX reference (for correctness check only) -------------------------
def _reference(weight, lq, lk, *, bidirectional=True, max_dist=128):
    num_buckets, _ = weight.shape
    rel_pos = jnp.arange(lk)[None, :] - jnp.arange(lq)[:, None]
    if bidirectional:
        nb = num_buckets // 2
        buckets = (rel_pos > 0).astype(jnp.int32) * nb
        rel = jnp.abs(rel_pos)
    else:
        nb = num_buckets
        buckets = jnp.zeros_like(rel_pos)
        rel = -jnp.minimum(rel_pos, 0)
    max_exact = nb // 2
    rel_f = jnp.maximum(rel, 1).astype(jnp.float32)
    large = max_exact + (jnp.log(rel_f / max_exact)
                         / math.log(max_dist / max_exact)
                         * (nb - max_exact)).astype(jnp.int32)
    large = jnp.minimum(large, nb - 1)
    buckets = buckets + jnp.where(rel < max_exact, rel, large)
    emb = weight[buckets]                       # [lq, lk, H]
    return jnp.transpose(emb, (2, 0, 1))[None]  # [1, H, lq, lk]


if __name__ == "__main__":
    num_buckets, num_heads = 32, 8
    lq, lk = 16, 16
    max_dist = 128

    key = jax.random.PRNGKey(0)
    # nn.Embedding default init is N(0, 1); deterministic synthetic weights.
    weight = jax.random.normal(key, (num_buckets, num_heads), dtype=jnp.float32)

    ref_bi = _reference(weight, lq, lk, bidirectional=True, max_dist=max_dist)
    ref_uni = _reference(weight, lq, lk, bidirectional=False, max_dist=max_dist)

    # 1) default (single-tile) path
    out = jax.block_until_ready(
        t5_relative_embedding(weight, lq, lk, bidirectional=True,
                              max_dist=max_dist))
    assert out.shape == (1, num_heads, lq, lk), out.shape
    assert jnp.allclose(out, ref_bi, atol=1e-5, rtol=1e-5), "mismatch (single tile)"

    # 2) force the multi-tile grid + padded-lk path (grid=(4,), lk padded to 128)
    out2 = jax.block_until_ready(
        t5_relative_embedding(weight, lq, lk, bidirectional=True,
                              max_dist=max_dist, target_tile_elems=512))
    assert out2.shape == (1, num_heads, lq, lk), out2.shape
    assert jnp.allclose(out2, ref_bi, atol=1e-5, rtol=1e-5), "mismatch (tiled/padded)"

    # 3) unidirectional bucket path
    out3 = jax.block_until_ready(
        t5_relative_embedding(weight, lq, lk, bidirectional=False,
                              max_dist=max_dist))
    assert out3.shape == (1, num_heads, lq, lk), out3.shape
    assert jnp.allclose(out3, ref_uni, atol=1e-5, rtol=1e-5), "mismatch (unidirectional)"

    print("KERNEL_OK")
</pallas_src>

<mosaic_0001>
module attributes {stable_mosaic.version = 11 : i64} {
  func.func @_t5_rel_embed_kernel(%arg0: i32, %arg1: memref<8x32xf32, #tpu.memory_space<vmem>>, %arg2: memref<8x256xf32, #tpu.memory_space<vmem>>) attributes {dimension_semantics = [#tpu.dimension_semantics<parallel>], iteration_bounds = array<i64: 1>, scalar_prefetch = 0 : i64, scratch_operands = 0 : i64, tpu.core_type = #tpu.core_type<tc>, window_params = [{pipeline_mode = #tpu.pipeline_mode<synchronous>, transform_indices = @transform_0, window_bounds = array<i64: 8, 32>}, {transform_indices = @transform_1, window_bounds = array<i64: 8, 256>}]} {
    %c16_i32 = arith.constant 16 : i32
    %0 = arith.muli %arg0, %c16_i32 : i32
    %1 = tpu.iota {dimensions = array<i32: 1>} : vector<1x256xi32>
    %2 = arith.sitofp %1 : vector<1x256xi32> to vector<1x256xf32>
    %cst = arith.constant 5.000000e-01 : f32
    %3 = vector.broadcast %cst : f32 to vector<1x256xf32>
    %4 = arith.addf %2, %3 : vector<1x256xf32>
    %cst_0 = arith.constant 1.600000e+01 : f32
    %5 = vector.broadcast %cst_0 : f32 to vector<1x256xf32>
    %6 = arith.divf %4, %5 : vector<1x256xf32>
    %7 = math.floor %6 : vector<1x256xf32>
    %8 = arith.fptosi %7 : vector<1x256xf32> to vector<1x256xi32>
    %c16_i32_1 = arith.constant 16 : i32
    %9 = vector.broadcast %c16_i32_1 : i32 to vector<1x256xi32>
    %10 = arith.muli %8, %9 : vector<1x256xi32>
    %11 = arith.subi %1, %10 : vector<1x256xi32>
    %12 = vector.broadcast %0 : i32 to vector<1x256xi32>
    %13 = arith.addi %12, %8 : vector<1x256xi32>
    %14 = arith.subi %11, %13 : vector<1x256xi32>
    %c0_i32 = arith.constant 0 : i32
    %15 = vector.broadcast %c0_i32 : i32 to vector<1x256xi32>
    %16 = arith.cmpi sgt, %14, %15 : vector<1x256xi32>
    %17 = arith.extui %16 : vector<1x256xi1> to vector<1x256xi32>
    %c16_i32_2 = arith.constant 16 : i32
    %18 = vector.broadcast %c16_i32_2 : i32 to vector<1x256xi32>
    %19 = arith.muli %17, %18 : vector<1x256xi32>
    %20 = math.absi %14 : vector<1x256xi32>
    %c1_i32 = arith.constant 1 : i32
    %21 = vector.broadcast %c1_i32 : i32 to vector<1x256xi32>
    %22 = arith.maxsi %20, %21 : vector<1x256xi32>
    %23 = arith.sitofp %22 : vector<1x256xi32> to vector<1x256xf32>
    %cst_3 = arith.constant 8.000000e+00 : f32
    %24 = vector.broadcast %cst_3 : f32 to vector<1x256xf32>
    %25 = arith.divf %23, %24 : vector<1x256xf32>
    %26 = math.log %25 : vector<1x256xf32>
    %cst_4 = arith.constant 2.77258873 : f32
    %27 = vector.broadcast %cst_4 : f32 to vector<1x256xf32>
    %28 = arith.divf %26, %27 : vector<1x256xf32>
    %cst_5 = arith.constant 8.000000e+00 : f32
    %29 = vector.broadcast %cst_5 : f32 to vector<1x256xf32>
    %30 = arith.mulf %28, %29 : vector<1x256xf32>
    %31 = arith.fptosi %30 : vector<1x256xf32> to vector<1x256xi32>
    %c8_i32 = arith.constant 8 : i32
    %32 = vector.broadcast %c8_i32 : i32 to vector<1x256xi32>
    %33 = arith.addi %32, %31 : vector<1x256xi32>
    %c15_i32 = arith.constant 15 : i32
    %34 = vector.broadcast %c15_i32 : i32 to vector<1x256xi32>
    %35 = arith.minsi %33, %34 : vector<1x256xi32>
    %c8_i32_6 = arith.constant 8 : i32
    %36 = vector.broadcast %c8_i32_6 : i32 to vector<1x256xi32>
    %37 = arith.cmpi slt, %20, %36 : vector<1x256xi32>
    %38 = arith.select %37, %20, %35 : vector<1x256xi1>, vector<1x256xi32>
    %39 = arith.addi %19, %38 : vector<1x256xi32>
    %40 = tpu.iota {dimensions = array<i32: 0>} : vector<32x256xi32>
    %41 = vector.broadcast %39 : vector<1x256xi32> to vector<32x256xi32>
    %42 = arith.cmpi eq, %41, %40 : vector<32x256xi32>
    %43 = arith.extui %42 : vector<32x256xi1> to vector<32x256xi32>
    %44 = arith.sitofp %43 : vector<32x256xi32> to vector<32x256xf32>
    %c0 = arith.constant 0 : index
    %c0_7 = arith.constant 0 : index
    %45 = vector.load %arg1[%c0, %c0_7] : memref<8x32xf32, #tpu.memory_space<vmem>>, vector<8x32xf32>
    %cst_8 = arith.constant dense<0.000000e+00> : vector<8x256xf32>
    %46 = tpu.matmul %45, %44, %cst_8 {dimension_numbers = #tpu.dot_dimension_numbers<[1], [0], [0], [1], [0, 0, 1, 1], [], []>} : vector<8x32xf32>, vector<32x256xf32>, vector<8x256xf32> -> vector<8x256xf32>
    %c0_9 = arith.constant 0 : index
    %c0_10 = arith.constant 0 : index
    %47 = vector.load %arg2[%c0_9, %c0_10] : memref<8x256xf32, #tpu.memory_space<vmem>>, vector<8x256xf32>
    tpu.vector_store %arg2[%c0_9, %c0_10], %46 {strides = array<i32>} : memref<8x256xf32, #tpu.memory_space<vmem>>, vector<8x256xf32>,
    return
  }
  func.func @transform_0(%arg0: i32) -> (i32, i32) {
    %c0_i32 = arith.constant 0 : i32
    %c0_i32_0 = arith.constant 0 : i32
    %c0_i32_1 = arith.constant 0 : i32
    return %c0_i32, %c0_i32_0 : i32, i32
  }
  func.func @transform_1(%arg0: i32) -> (i32, i32) {
    %c0_i32 = arith.constant 0 : i32
    %c0_i32_0 = arith.constant 0 : i32
    return %c0_i32, %arg0 : i32, i32
  }
}

</mosaic_0001>

<bundles_post_ra>
// kernel: tpu_custom_call.1
= control target key start
LH: loop header
LB: loop body
LE: loop exit
PB: predicated region body
PF: predicated region fallthrough
CT: control target
= control target key end

     0   :  { %6 = vsyncpa [#allocation3], 0  ;;  %s312_s0 = inlined_call_operand.hbm [shape: f32[8,32], index: 0, kind: input, shape index: {}]   ;;  %s313_s1 = inlined_call_operand.hbm [shape: f32[8,256], index: 1, kind: output, shape index: {}]  }
   0x1   :  { %7 = vsyncpa [#allocation4], 0  ;;  %s291_s6 = smov [#allocation2]  }
   0x2   :  { %s14_s7 = sshll.u32 %s291_s6, 4  ;;  %s15_s7 = int_to_ptr.vmem [resolvable:$true] %s14_s7 }
   0x3   :  { %s255_s8 = scalar_lea.vmem %s15_s7, 128  ;;  %p260_p1 = scmp.lt.s32.totalorder %s15_s7, %s15_s7 }
   0x4   :  { %p256_p0 = scmp.ne.s32.totalorder %s15_s7, %s255_s8  ;;  %p261_p2 = scmp.lt.s32.totalorder %s255_s8, %s255_s8 }
   0x6   :  { %p262_p3 = por %p261_p2, %p260_p1 }
   0x8   :  { %p263_p4 = pnand %p262_p3, %p256_p0 }
   0xa   :  { %266 = shalt.err (!%p263_p4)
}
   0xb   :  { %17 = dma.hbm_to_vmem [thread:$0]  %s312_s0, 128, %s15_s7, [#allocation3]  }
   0xc   :  { %287 = dma.done.wait [#allocation3], 128  }
   0xd   :  { %288 = vsyncadd [#allocation3], 4294967168  ;;  %v22_v0 = vlaneseq  ;;  %v292_v1 = vmov 0.0   ;;  %v293_v42 = vmov 0   ;;  %v294_v61 = vmov 1.0   ;;  %v118_v62 = vld [vmem:[#allocation2] sm:$0xff] }
   0xe   :  { %187 = vmatprep.mubr.f32.mxu0 %v292_v1  ;;  %s295_s0 = smov [#allocation5]  }
   0xf   :  { %v23_v2 = vand.u32 127, %v22_v0  ;;  %v90_v47 = vshrl.u32 %v22_v0, 7  ;;  %s202_s11 = sshll.u32 %s295_s0, 4  ;;  %s203_s11 = int_to_ptr.vmem [resolvable:$true] %s202_s11 }
  0x10   :  { %s267_s12 = scalar_lea.vmem %s203_s11, 256  ;;  %p272_p6 = scmp.lt.s32.totalorder %s203_s11, %s203_s11 }
  0x11   :  { %v24_v3 = vadd.s32 128, %v23_v2  ;;  %v25_v4 = vcvt.s32.f32 %v23_v2  ;;  %v93_v53 = vadd.s32 24, %v90_v47  ;;  %v92_v57 = vadd.s32 16, %v90_v47  ;;  %p268_p5 = scmp.ne.s32.totalorder %s203_s11, %s267_s12  ;;  %p273_p7 = scmp.lt.s32.totalorder %s267_s12, %s267_s12 }
  0x12   :  { %v91_v60 = vadd.s32 8, %v90_v47 }
  0x13   :  { %v26_v5 = vcvt.s32.f32 %v24_v3  ;;  %v27_v6 = vadd.f32 0.5, %v25_v4  ;;  %p274_p8 = por %p273_p7, %p272_p6 }
  0x15   :  { %v28_v7 = vadd.f32 0.5, %v26_v5  ;;  %v30_v8 = vmul.f32 0.0625, %v27_v6  ;;  %p275_p9 = pnand %p274_p8, %p268_p5 }
  0x17   :  { %v31_v9 = vmul.f32 0.0625, %v28_v7  ;;  %v32_v10 = vfloor.f32 %v30_v8 }
  0x19   :  { %v33_v11 = vfloor.f32 %v31_v9  ;;  %v230_v12 = vtrunc.f32 %v32_v10 }
  0x1b   :  { %v232_v13 = vtrunc.f32 %v33_v11  ;;  %v231_v14 = vcvt.f32.s32 %v230_v12 }
  0x1d   :  { %v233_v15 = vcvt.f32.s32 %v232_v13  ;;  %v36_v16 = vmul.u32 16, %v231_v14 }
  0x1f   :  { %v37_v17 = vmul.u32 16, %v233_v15  ;;  %v38_v18 = vsub.s32 %v23_v2, %v36_v16 }
  0x21   :  { %v39_v19 = vsub.s32 %v24_v3, %v37_v17  ;;  %v43_v20 = vsub.s32 %v38_v18, %v231_v14 }
  0x23   :  { %v44_v21 = vsub.s32 %v39_v19, %v233_v15  ;;  %v52_v22 = vsub.s32 0, %v43_v20  ;;  %vm45_vm2 = vcmp.gt.s32.totalorder %v43_v20, 0 }
  0x24   :  { %v47_v43 = vsel %vm45_vm2, 1, %v293_v42 }
  0x25   :  { %v55_v23 = vsub.s32 0, %v44_v21  ;;  %v211_v24 = vmin.u32 %v52_v22, %v43_v20  ;;  %vm46_vm3 = vcmp.gt.s32.totalorder %v44_v21, 0  ;;  %v49_v49 = vmul.u32 16, %v47_v43 }
  0x26   :  { %v48_v45 = vsel %vm46_vm3, 1, %v293_v42 }
  0x27   :  { %v212_v25 = vmin.u32 %v55_v23, %v44_v21  ;;  %vm57_vm0 = vcmp.gt.s32.totalorder %v211_v24, 1  ;;  %vm83_vm4 = vcmp.lt.s32.totalorder %v211_v24, 8  ;;  %v50_v51 = vmul.u32 16, %v48_v45 }
  0x28   :  { %v58_v26 = vsel %vm57_vm0, %v211_v24, 1  ;;  %vm119_vm0 = vcmask 261120  }
  0x29   :  { %vm59_vm1 = vcmp.gt.s32.totalorder %v212_v25, 1  ;;  %v61_v27 = vcvt.s32.f32 %v58_v26  ;;  %vm84_vm6 = vcmp.lt.s32.totalorder %v212_v25, 8 }
  0x2a   :  { %v60_v28 = vsel %vm59_vm1, %v212_v25, 1 }
  0x2b   :  { %v62_v29 = vcvt.s32.f32 %v60_v28  ;;  %v64_v30 = vmul.f32 0.125, %v61_v27 }
  0x2d   :  { %v65_v31 = vmul.f32 0.125, %v62_v29  ;;  %243 = vlog2.f32 %v64_v30 }
  0x2f   :  { %245 = vlog2.f32 %v65_v31 }
  0x3a   :  { %v244_v32 = vpop.eup %243 }
  0x3b   :  { %v67_v33 = vmul.f32 0.6931472, %v244_v32 }
  0x3c   :  { %v246_v34 = vpop.eup %245 }
  0x3d   :  { %v69_v35 = vmul.f32 0.6931472, %v246_v34  ;;  %v71_v36 = vmul.f32 0.36067376, %v67_v33 }
  0x3f   :  { %v72_v37 = vmul.f32 0.36067376, %v69_v35  ;;  %v73_v38 = vmul.f32 8.0, %v71_v36 }
  0x41   :  { %v74_v39 = vmul.f32 8.0, %v72_v37  ;;  %v234_v40 = vtrunc.f32 %v73_v38 }
  0x43   :  { %v236_v41 = vtrunc.f32 %v74_v39  ;;  %v235_v44 = vcvt.f32.s32 %v234_v40 }
  0x45   :  { %v237_v46 = vcvt.f32.s32 %v236_v41  ;;  %v77_v48 = vadd.s32 8, %v235_v44 }
  0x47   :  { %v78_v50 = vadd.s32 8, %v237_v46  ;;  %vm79_vm5 = vcmp.lt.s32.totalorder %v77_v48, 15 }
  0x48   :  { %v80_v52 = vsel %vm79_vm5, %v77_v48, 15 }
  0x49   :  { %vm81_vm7 = vcmp.lt.s32.totalorder %v78_v50, 15  ;;  %v85_v54 = vsel %vm83_vm4, %v211_v24, %v80_v52 }
  0x4a   :  { %v82_v55 = vsel %vm81_vm7, %v78_v50, 15  ;;  %v87_v56 = vadd.s32 %v85_v54, %v49_v49 }
  0x4b   :  { %v86_v58 = vsel %vm84_vm6, %v212_v25, %v82_v55 }
  0x4c   :  { %v88_v59 = vadd.s32 %v86_v58, %v50_v51  ;;  %vm100_vm8 = vcmp.eq.s32.totalorder %v87_v56, %v93_v53  ;;  %vm98_vm11 = vcmp.eq.s32.totalorder %v87_v56, %v92_v57  ;;  %vm96_vm13 = vcmp.eq.s32.totalorder %v87_v56, %v91_v60 }
  0x4d   :  { %vm94_vm15 = vcmp.eq.s32.totalorder %v87_v56, %v90_v47 }
  0x4e   :  { %vm101_vm9 = vcmp.eq.s32.totalorder %v88_v59, %v93_v53  ;;  %vm99_vm10 = vcmp.eq.s32.totalorder %v88_v59, %v92_v57  ;;  %vm97_vm12 = vcmp.eq.s32.totalorder %v88_v59, %v91_v60  ;;  %vm95_vm14 = vcmp.eq.s32.totalorder %v88_v59, %v90_v47 }
  0x4f   :  { %221 = vmatprep.subr.msk.mxu0 %vm101_vm9, %v294_v61 }
  0x50   :  { %222 = vmatpush1.msk.msra.mxu0 %vm100_vm8, %v294_v61 }
  0x51   :  { %223 = vmatprep.subr.msk.mxu0 %vm99_vm10, %v294_v61 }
  0x52   :  { %224 = vmatpush1.msk.msra.mxu0 %vm98_vm11, %v294_v61 }
  0x53   :  { %225 = vmatprep.subr.msk.mxu0 %vm97_vm12, %v294_v61 }
  0x54   :  { %226 = vmatpush1.msk.msra.mxu0 %vm96_vm13, %v294_v61 }
  0x55   :  { %227 = vmatprep.subr.msk.mxu0 %vm95_vm14, %v294_v61 }
  0x56   :  { %228 = vmatpush1.msk.msra.mxu0 %vm94_vm15, %v294_v61 }
  0x57   :  { %229 = vmatmul.mubr.msk.f32.vlgmr.msra.gmra.mxu0 %vm119_vm0, %v118_v62 }
 0x117   :  { %v189_v63 = vpop.f32.mrf.mxu0 }
 0x118   :  { %194 = vst [vmem:[#allocation5] sm:$0xff] %v189_v63 }
 0x119   :  { %v191_v0 = vpop.f32.mrf.mxu0 }
 0x11a   :  { %195 = vst [vmem:[#allocation5 + $0x8] sm:$0xff] %v191_v0 }
 0x11b   :  { %278 = shalt.err (!%p275_p9)
}
 0x11c   :  { %205 = dma.vmem_to_hbm [thread:$0]  %s203_s11, 256, %s313_s1, [#allocation4]  }
 0x11d   :  { %289 = dma.done.wait [#allocation4], 256  }
 0x11e   :  { %290 = vsyncadd [#allocation4], 4294967040 }
 0x11f   :  { %209 = vsyncpa [#allocation3], 1 }
 0x120   :  { %210 = vsyncpa [#allocation4], 1 }

</bundles_post_ra>
